<compile_context>
chip_gen: v5e
topology: v5e:2x2
jax: 0.10.0
libtpu: 0.0.40
codegen_flags: <defaults>
</compile_context>

<pallas_src>
import functools

import jax
import jax.numpy as jnp
from jax.experimental import pallas as pl
from jax.experimental.pallas import tpu as pltpu


# ---------------------------------------------------------------------------
# forward(): returns (centroid_s, centroid_t) — no compute, no kernel needed.
# ---------------------------------------------------------------------------
def centroid_forward(centroid_s, centroid_t):
    return centroid_s, centroid_t


# ---------------------------------------------------------------------------
# update_centroids(): fused per-class masked mean + EMA (the module hot path)
# ---------------------------------------------------------------------------
def _update_kernel(feat_s_ref, label_s_ref, feat_t_ref, label_t_ref,
                   cen_ref, out_ref, *, ratio_ma, num_classes):
    # grid = (2,): side 0 = source, side 1 = target ("parallel" -> on v7x the
    # two TensorCores each take one domain; no-op on v5e/v6e).
    side = pl.program_id(0)

    def side_update(feat_ref, label_ref):
        feat = feat_ref[...].astype(jnp.bfloat16)             # (N, D) bf16
        labels = label_ref[...]                                # (1, N) int32
        n = feat.shape[0]

        # Lane-major one-hot, already transposed: (C, N).  Exact 0/1.
        cls_ids = jax.lax.broadcasted_iota(jnp.int32, (num_classes, n), 0)
        onehot_t = labels == cls_ids                           # (C, N) bool

        # MXU (native orientation): sums[c, d] = sum_n onehot[c, n] * feat[n, d]
        sums = jnp.dot(onehot_t.astype(feat.dtype), feat,
                       preferred_element_type=jnp.float32)     # (C, D) f32

        # XLU lane-reduce for the per-class counts (MXU not issued twice).
        counts = jnp.sum(onehot_t.astype(jnp.float32), axis=-1,
                         keepdims=True)                        # (C, 1) f32

        # Exact divide; empty classes contribute a zero "current" centroid,
        # matching the PyTorch module (old centroid decays by ratio_ma).
        mean = jnp.where(counts > 0.0, sums / jnp.maximum(counts, 1.0), 0.0)

        out_ref[...] = (ratio_ma * cen_ref[...]
                        + (1.0 - ratio_ma) * mean).astype(out_ref.dtype)

    @pl.when(side == 0)
    def _():
        side_update(feat_s_ref, label_s_ref)

    @pl.when(side == 1)
    def _():
        side_update(feat_t_ref, label_t_ref)


def centroid_update(feat_s, feat_t, y_s, y_t, centroid_s, centroid_t,
                    method_centroid="prob_hard", ratio_ma=0.9):
    """Pallas implementation of Centroid.update_centroids."""
    # Label glue (matches the PyTorch module): source labels are hard labels;
    # target labels come from argmax over class probabilities.  The argmax is
    # a tiny XLA op kept in the wrapper to preserve first-max tie-breaking.
    label_s = y_s.astype(jnp.int32).reshape(1, -1)             # (1, Ns) lane-major
    if method_centroid == "prob_hard":
        label_t = jnp.argmax(y_t, axis=1).astype(jnp.int32).reshape(1, -1)
    else:
        label_t = y_t.astype(jnp.int32).reshape(1, -1)

    C, D = centroid_s.shape
    Ns, Nt = feat_s.shape[0], feat_t.shape[0]

    feat_s = feat_s.astype(jnp.float32)
    feat_t = feat_t.astype(jnp.float32)
    # Only the (2, C, D) centroid state is stacked (tiny), so it can be
    # aliased to the output and updated in place.
    cents = jnp.stack([centroid_s, centroid_t]).astype(jnp.float32)

    # Explicit VMEM budget (review: v5e default scoped limit is 16 MiB,
    # v7x total VMEM is 64 MiB).  Estimate = double-buffered inputs + outputs.
    est = 4 * (2 * (feat_s.size + feat_t.size + label_s.size + label_t.size)
               + 4 * cents.size) + (2 << 20)
    vmem_limit = int(min(max(est, 8 << 20), 48 << 20))

    kernel = functools.partial(_update_kernel, ratio_ma=float(ratio_ma),
                               num_classes=C)
    out = pl.pallas_call(
        kernel,
        out_shape=jax.ShapeDtypeStruct((2, C, D), jnp.float32),
        grid=(2,),
        in_specs=[
            pl.BlockSpec((Ns, D), lambda s: (0, 0)),   # feat_s  (full block)
            pl.BlockSpec((1, Ns), lambda s: (0, 0)),   # label_s (lane-major)
            pl.BlockSpec((Nt, D), lambda s: (0, 0)),   # feat_t  (full block)
            pl.BlockSpec((1, Nt), lambda s: (0, 0)),   # label_t (lane-major)
            pl.BlockSpec((None, C, D), lambda s: (s, 0, 0)),   # centroid[side]
        ],
        out_specs=pl.BlockSpec((None, C, D), lambda s: (s, 0, 0)),
        input_output_aliases={4: 0},                   # centroids in place
        compiler_params=pltpu.CompilerParams(
            dimension_semantics=("parallel",),
            vmem_limit_bytes=vmem_limit),
    )(feat_s, label_s, feat_t, label_t, cents)
    return out[0], out[1]


# ---------------------------------------------------------------------------
# reference (pure JAX) for correctness check of the update path
# ---------------------------------------------------------------------------
def _update_ref(feat, labels, centroid, ratio_ma):
    C, D = centroid.shape
    rows = []
    for i in range(C):
        mask = labels == i
        cnt = jnp.sum(mask)
        s = jnp.sum(jnp.where(mask[:, None], feat, 0.0), axis=0)
        cur = jnp.where(cnt > 0, s / jnp.maximum(cnt, 1), jnp.zeros((D,)))
        rows.append(ratio_ma * centroid[i] + (1.0 - ratio_ma) * cur)
    return jnp.stack(rows, axis=0)


if __name__ == "__main__":
    num_f_maps = 32    # D
    num_classes = 4    # C
    N_s, N_t = 500, 512    # frames per domain (exercises unequal, non-aligned N)
    ratio_ma = 0.9

    key = jax.random.PRNGKey(0)
    k1, k2, k3, k4, k5, k6 = jax.random.split(key, 6)

    # registered buffers start as zeros (as in __init__); forward returns them
    centroid_s0 = jnp.zeros((num_classes, num_f_maps), jnp.float32)
    centroid_t0 = jnp.zeros((num_classes, num_f_maps), jnp.float32)
    cs_out, ct_out = centroid_forward(centroid_s0, centroid_t0)
    jax.block_until_ready((cs_out, ct_out))
    assert cs_out.shape == (num_classes, num_f_maps)
    assert ct_out.shape == (num_classes, num_f_maps)

    # ---- update_centroids (the module's compute) ----
    centroid_s = jax.random.normal(k5, (num_classes, num_f_maps), jnp.float32)
    centroid_t = jax.random.normal(k6, (num_classes, num_f_maps), jnp.float32)
    feat_s = jax.random.normal(k1, (N_s, num_f_maps), jnp.float32)
    feat_t = jax.random.normal(k2, (N_t, num_f_maps), jnp.float32)
    y_s = jax.random.randint(k3, (N_s,), 0, num_classes)           # hard labels
    y_t = jax.random.normal(k4, (N_t, num_classes), jnp.float32)   # class probs

    new_cs, new_ct = centroid_update(feat_s, feat_t, y_s, y_t,
                                     centroid_s, centroid_t,
                                     method_centroid="prob_hard",
                                     ratio_ma=ratio_ma)
    jax.block_until_ready((new_cs, new_ct))

    ref_cs = _update_ref(feat_s, y_s.astype(jnp.int32), centroid_s, ratio_ma)
    ref_ct = _update_ref(feat_t, jnp.argmax(y_t, axis=1), centroid_t, ratio_ma)
    # Error budget: bf16 MXU operands (exact one-hot, ~1e-3 relative on feat),
    # f32 accumulation, exact divide -> well inside 5e-3.
    assert jnp.allclose(new_cs, ref_cs, atol=5e-3, rtol=5e-3), \
        float(jnp.max(jnp.abs(new_cs - ref_cs)))
    assert jnp.allclose(new_ct, ref_ct, atol=5e-3, rtol=5e-3), \
        float(jnp.max(jnp.abs(new_ct - ref_ct)))

    print("KERNEL_OK")
</pallas_src>

<mosaic_0001>
module attributes {stable_mosaic.version = 11 : i64} {
  func.func @_update_kernel(%arg0: i32, %arg1: memref<500x32xf32, #tpu.memory_space<vmem>>, %arg2: memref<1x500xi32, #tpu.memory_space<vmem>>, %arg3: memref<512x32xf32, #tpu.memory_space<vmem>>, %arg4: memref<1x512xi32, #tpu.memory_space<vmem>>, %arg5: memref<1x4x32xf32, #tpu.memory_space<vmem>>, %arg6: memref<1x4x32xf32, #tpu.memory_space<vmem>>) attributes {dimension_semantics = [#tpu.dimension_semantics<parallel>], iteration_bounds = array<i64: 2>, scalar_prefetch = 0 : i64, scratch_operands = 0 : i64, tpu.core_type = #tpu.core_type<tc>, window_params = [{pipeline_mode = #tpu.pipeline_mode<synchronous>, transform_indices = @transform_0, window_bounds = array<i64: 500, 32>}, {pipeline_mode = #tpu.pipeline_mode<synchronous>, transform_indices = @transform_1, window_bounds = array<i64: 1, 500>}, {pipeline_mode = #tpu.pipeline_mode<synchronous>, transform_indices = @transform_2, window_bounds = array<i64: 512, 32>}, {pipeline_mode = #tpu.pipeline_mode<synchronous>, transform_indices = @transform_3, window_bounds = array<i64: 1, 512>}, {transform_indices = @transform_4, window_bounds = array<i64: 1, 4, 32>}, {transform_indices = @transform_5, window_bounds = array<i64: 1, 4, 32>}]} {
    %c0_i32 = arith.constant 0 : i32
    %0 = arith.cmpi eq, %arg0, %c0_i32 : i32
    %1 = arith.extui %0 : i1 to i32
    %c0_i32_0 = arith.constant 0 : i32
    %2 = arith.cmpi ne, %1, %c0_i32_0 : i32
    scf.if %2 {
      %c0 = arith.constant 0 : index
      %c0_2 = arith.constant 0 : index
      %6 = vector.load %arg1[%c0, %c0_2] : memref<500x32xf32, #tpu.memory_space<vmem>>, vector<500x32xf32>
      %7 = arith.truncf %6 : vector<500x32xf32> to vector<500x32xbf16>
      %c0_3 = arith.constant 0 : index
      %c0_4 = arith.constant 0 : index
      %8 = vector.load %arg2[%c0_3, %c0_4] : memref<1x500xi32, #tpu.memory_space<vmem>>, vector<1x500xi32>
      %9 = tpu.iota {dimensions = array<i32: 0>} : vector<4x500xi32>
      %10 = vector.broadcast %8 : vector<1x500xi32> to vector<4x500xi32>
      %11 = arith.cmpi eq, %10, %9 : vector<4x500xi32>
      %12 = arith.extui %11 : vector<4x500xi1> to vector<4x500xi32>
      %13 = arith.sitofp %12 : vector<4x500xi32> to vector<4x500xf32>
      %14 = arith.truncf %13 : vector<4x500xf32> to vector<4x500xbf16>
      %cst = arith.constant dense<0.000000e+00> : vector<4x32xf32>
      %15 = tpu.matmul %14, %7, %cst {dimension_numbers = #tpu.dot_dimension_numbers<[1], [0], [0], [1], [0, 0, 1, 1], [], []>} : vector<4x500xbf16>, vector<500x32xbf16>, vector<4x32xf32> -> vector<4x32xf32>
      %16 = arith.extui %11 : vector<4x500xi1> to vector<4x500xi32>
      %17 = arith.sitofp %16 : vector<4x500xi32> to vector<4x500xf32>
      %cst_5 = arith.constant dense<0.000000e+00> : vector<4xf32>
      %18 = vector.multi_reduction <add>, %17, %cst_5 [1] : vector<4x500xf32> to vector<4xf32>
      %19 = vector.shape_cast %18 : vector<4xf32> to vector<4x1xf32>
      %cst_6 = arith.constant 0.000000e+00 : f32
      %20 = vector.broadcast %cst_6 : f32 to vector<4x1xf32>
      %21 = arith.cmpf ogt, %19, %20 : vector<4x1xf32>
      %cst_7 = arith.constant 1.000000e+00 : f32
      %22 = vector.broadcast %cst_7 : f32 to vector<4x1xf32>
      %23 = arith.maximumf %19, %22 : vector<4x1xf32>
      %24 = vector.broadcast %23 : vector<4x1xf32> to vector<4x32xf32>
      %25 = arith.divf %15, %24 : vector<4x32xf32>
      %cst_8 = arith.constant 0.000000e+00 : f32
      %26 = vector.shape_cast %21 : vector<4x1xi1> to vector<4x1xi1>
      %27 = vector.broadcast %26 : vector<4x1xi1> to vector<4x32xi1>
      %28 = vector.broadcast %cst_8 : f32 to vector<4x32xf32>
      %29 = arith.select %27, %25, %28 : vector<4x32xi1>, vector<4x32xf32>
      %c0_9 = arith.constant 0 : index
      %c0_10 = arith.constant 0 : index
      %c0_11 = arith.constant 0 : index
      %30 = vector.load %arg5[%c0_9, %c0_10, %c0_11] : memref<1x4x32xf32, #tpu.memory_space<vmem>>, vector<1x4x32xf32>
      %31 = vector.shape_cast %30 : vector<1x4x32xf32> to vector<4x32xf32>
      %cst_12 = arith.constant 0.899999976 : f32
      %32 = vector.broadcast %cst_12 : f32 to vector<4x32xf32>
      %33 = arith.mulf %32, %31 : vector<4x32xf32>
      %cst_13 = arith.constant 1.000000e-01 : f32
      %34 = vector.broadcast %cst_13 : f32 to vector<4x32xf32>
      %35 = arith.mulf %34, %29 : vector<4x32xf32>
      %36 = arith.addf %33, %35 : vector<4x32xf32>
      %c0_14 = arith.constant 0 : index
      %c0_15 = arith.constant 0 : index
      %c0_16 = arith.constant 0 : index
      %37 = vector.load %arg6[%c0_14, %c0_15, %c0_16] : memref<1x4x32xf32, #tpu.memory_space<vmem>>, vector<1x4x32xf32>
      %38 = vector.shape_cast %37 : vector<1x4x32xf32> to vector<4x32xf32>
      %39 = vector.shape_cast %36 : vector<4x32xf32> to vector<1x4x32xf32>
      tpu.vector_store %arg6[%c0_14, %c0_15, %c0_16], %39 {strides = array<i32>} : memref<1x4x32xf32, #tpu.memory_space<vmem>>, vector<1x4x32xf32>,
    } else {
    }
    %c1_i32 = arith.constant 1 : i32
    %3 = arith.cmpi eq, %arg0, %c1_i32 : i32
    %4 = arith.extui %3 : i1 to i32
    %c0_i32_1 = arith.constant 0 : i32
    %5 = arith.cmpi ne, %4, %c0_i32_1 : i32
    scf.if %5 {
      %c0 = arith.constant 0 : index
      %c0_2 = arith.constant 0 : index
      %6 = vector.load %arg3[%c0, %c0_2] : memref<512x32xf32, #tpu.memory_space<vmem>>, vector<512x32xf32>
      %7 = arith.truncf %6 : vector<512x32xf32> to vector<512x32xbf16>
      %c0_3 = arith.constant 0 : index
      %c0_4 = arith.constant 0 : index
      %8 = vector.load %arg4[%c0_3, %c0_4] : memref<1x512xi32, #tpu.memory_space<vmem>>, vector<1x512xi32>
      %9 = tpu.iota {dimensions = array<i32: 0>} : vector<4x512xi32>
      %10 = vector.broadcast %8 : vector<1x512xi32> to vector<4x512xi32>
      %11 = arith.cmpi eq, %10, %9 : vector<4x512xi32>
      %12 = arith.extui %11 : vector<4x512xi1> to vector<4x512xi32>
      %13 = arith.sitofp %12 : vector<4x512xi32> to vector<4x512xf32>
      %14 = arith.truncf %13 : vector<4x512xf32> to vector<4x512xbf16>
      %cst = arith.constant dense<0.000000e+00> : vector<4x32xf32>
      %15 = tpu.matmul %14, %7, %cst {dimension_numbers = #tpu.dot_dimension_numbers<[1], [0], [0], [1], [0, 0, 1, 1], [], []>} : vector<4x512xbf16>, vector<512x32xbf16>, vector<4x32xf32> -> vector<4x32xf32>
      %16 = arith.extui %11 : vector<4x512xi1> to vector<4x512xi32>
      %17 = arith.sitofp %16 : vector<4x512xi32> to vector<4x512xf32>
      %cst_5 = arith.constant dense<0.000000e+00> : vector<4xf32>
      %18 = vector.multi_reduction <add>, %17, %cst_5 [1] : vector<4x512xf32> to vector<4xf32>
      %19 = vector.shape_cast %18 : vector<4xf32> to vector<4x1xf32>
      %cst_6 = arith.constant 0.000000e+00 : f32
      %20 = vector.broadcast %cst_6 : f32 to vector<4x1xf32>
      %21 = arith.cmpf ogt, %19, %20 : vector<4x1xf32>
      %cst_7 = arith.constant 1.000000e+00 : f32
      %22 = vector.broadcast %cst_7 : f32 to vector<4x1xf32>
      %23 = arith.maximumf %19, %22 : vector<4x1xf32>
      %24 = vector.broadcast %23 : vector<4x1xf32> to vector<4x32xf32>
      %25 = arith.divf %15, %24 : vector<4x32xf32>
      %cst_8 = arith.constant 0.000000e+00 : f32
      %26 = vector.shape_cast %21 : vector<4x1xi1> to vector<4x1xi1>
      %27 = vector.broadcast %26 : vector<4x1xi1> to vector<4x32xi1>
      %28 = vector.broadcast %cst_8 : f32 to vector<4x32xf32>
      %29 = arith.select %27, %25, %28 : vector<4x32xi1>, vector<4x32xf32>
      %c0_9 = arith.constant 0 : index
      %c0_10 = arith.constant 0 : index
      %c0_11 = arith.constant 0 : index
      %30 = vector.load %arg5[%c0_9, %c0_10, %c0_11] : memref<1x4x32xf32, #tpu.memory_space<vmem>>, vector<1x4x32xf32>
      %31 = vector.shape_cast %30 : vector<1x4x32xf32> to vector<4x32xf32>
      %cst_12 = arith.constant 0.899999976 : f32
      %32 = vector.broadcast %cst_12 : f32 to vector<4x32xf32>
      %33 = arith.mulf %32, %31 : vector<4x32xf32>
      %cst_13 = arith.constant 1.000000e-01 : f32
      %34 = vector.broadcast %cst_13 : f32 to vector<4x32xf32>
      %35 = arith.mulf %34, %29 : vector<4x32xf32>
      %36 = arith.addf %33, %35 : vector<4x32xf32>
      %c0_14 = arith.constant 0 : index
      %c0_15 = arith.constant 0 : index
      %c0_16 = arith.constant 0 : index
      %37 = vector.load %arg6[%c0_14, %c0_15, %c0_16] : memref<1x4x32xf32, #tpu.memory_space<vmem>>, vector<1x4x32xf32>
      %38 = vector.shape_cast %37 : vector<1x4x32xf32> to vector<4x32xf32>
      %39 = vector.shape_cast %36 : vector<4x32xf32> to vector<1x4x32xf32>
      tpu.vector_store %arg6[%c0_14, %c0_15, %c0_16], %39 {strides = array<i32>} : memref<1x4x32xf32, #tpu.memory_space<vmem>>, vector<1x4x32xf32>,
    } else {
    }
    return
  }
  func.func @transform_0(%arg0: i32) -> (i32, i32) {
    %c0_i32 = arith.constant 0 : i32
    %c0_i32_0 = arith.constant 0 : i32
    %c0_i32_1 = arith.constant 0 : i32
    return %c0_i32, %c0_i32_0 : i32, i32
  }
  func.func @transform_1(%arg0: i32) -> (i32, i32) {
    %c0_i32 = arith.constant 0 : i32
    %c0_i32_0 = arith.constant 0 : i32
    %c0_i32_1 = arith.constant 0 : i32
    return %c0_i32, %c0_i32_0 : i32, i32
  }
  func.func @transform_2(%arg0: i32) -> (i32, i32) {
    %c0_i32 = arith.constant 0 : i32
    %c0_i32_0 = arith.constant 0 : i32
    %c0_i32_1 = arith.constant 0 : i32
    return %c0_i32, %c0_i32_0 : i32, i32
  }
  func.func @transform_3(%arg0: i32) -> (i32, i32) {
    %c0_i32 = arith.constant 0 : i32
    %c0_i32_0 = arith.constant 0 : i32
    %c0_i32_1 = arith.constant 0 : i32
    return %c0_i32, %c0_i32_0 : i32, i32
  }
  func.func @transform_4(%arg0: i32) -> (i32, i32, i32) {
    %c0_i32 = arith.constant 0 : i32
    %c0_i32_0 = arith.constant 0 : i32
    %c0_i32_1 = arith.constant 0 : i32
    return %arg0, %c0_i32, %c0_i32_0 : i32, i32, i32
  }
  func.func @transform_5(%arg0: i32) -> (i32, i32, i32) {
    %c0_i32 = arith.constant 0 : i32
    %c0_i32_0 = arith.constant 0 : i32
    %c0_i32_1 = arith.constant 0 : i32
    return %arg0, %c0_i32, %c0_i32_0 : i32, i32, i32
  }
}

</mosaic_0001>

<bundles_post_ra>
// kernel: tpu_custom_call.1
= control target key start
LH: loop header
LB: loop body
LE: loop exit
PB: predicated region body
PF: predicated region fallthrough
CT: control target
= control target key end

     0   :  { %10 = vsyncpa [#allocation3], 0  ;;  %s1582_s0 = inlined_call_operand.vmem [shape: f32[500,32], index: 0, kind: input, shape index: {}]   ;;  %s1583_s1 = inlined_call_operand.vmem [shape: s32[1,500], index: 1, kind: input, shape index: {}]   ;;  %s1584_s2 = inlined_call_operand.vmem [shape: f32[512,32], index: 2, kind: input, shape index: {}]   ;;  %s1585_s3 = inlined_call_operand.vmem [shape: s32[1,512], index: 3, kind: input, shape index: {}]   ;;  %s1586_s4 = inlined_call_operand.hbm [shape: f32[2,4,32], index: 4, kind: input, shape index: {}, may-alias: {4,5}]   ;;  %s1587_s5 = inlined_call_operand.hbm [shape: f32[2,4,32], index: 5, kind: output, shape index: {}, may-alias: {4,5}]  }
   0x1   :  { %12 = vsyncpa [#allocation3 + $0x1], 0 }
   0x2   :  { %13 = vsyncpa [#allocation4], 0 }
   0x3   :  { %15 = vsyncpa [#allocation4 + $0x1], 0  ;;  %s981_s18 = smov 0   ;;  %s983_s19 = smov 0  }
   0x4   :  { %s985_s20 = smov 0   ;;  %s987_s21 = smov 0  }
   0x5 LB: > { %s1002_s22 = sadd.s32 4294967295, %s945_s21   ;;  %s758_s23 = sadd.s32 4294967294, %s945_s21   ;;  %s945_s21 = sphi %s987_s21, %s1611_s21   ;;  %s941_s20 = sphi %s985_s20, %s1610_s20   ;;  %s937_s19 = sphi %s983_s19, %s1609_s19   ;;  %s933_s18 = sphi %s981_s18, %s1608_s18  }
   0x6   : > { %s1006_s24 = sadd.s32 1, %s945_s21   ;;  %s112_s25 = sadd.s32 1, %s941_s20 }
   0x7   : > { %s109_s26 = ssub.s32 %s945_s21, %s1006_s24  ;;  %p119_p0 = scmp.ne.s32.totalorder %s941_s20, %s937_s19 }
   0x8   : > { %p110_p1 = scmp.eq.s32.totalorder %s109_s26, 0  ;;  %p120_p2 = scmp.eq.s32.totalorder %s945_s21, 0 }
   0x9   : > { %p125_p3 = scmp.ne.s32.totalorder %s937_s19, %s933_s18  ;;  %p126_p4 = scmp.eq.s32.totalorder %s1002_s22, 0 }
   0xa   : > { %s1018_s27 = scalar_select %p110_p1, %s941_s20, %s112_s25  }
   0xb   : > { %p1020_p5 = por %p120_p2, %p119_p0  ;;  %p1024_p6 = por %p126_p4, %p125_p3 }
   0xc   : > { %p149_p7 = scmp.eq.s32.totalorder %s1002_s22, 1  ;;  %p155_p8 = scmp.eq.s32.totalorder %s758_s23, 1 }
   0xd   : > { %p807_p10 = scmp.lt.s32.totalorder %s945_s21, 2  ;;  %s187_s7 = sand.u32 1, %s941_s20  }
   0xe   : > { %p1031_p11 = por %p149_p7, %p119_p0  ;;  %p1035_p12 = por %p155_p8, %p125_p3 }
   0xf   : > { %s762_s8 = sshll.u32 %s945_s21, 2  ;;  %s761_s9 = sshll.u32 %s187_s7, 2 }
  0x10   : > { %s195_s12 = scalar_lea.hbm %s1586_s4, %s762_s8  ;;  %s191_s14 = scalar_lea.vmem [#allocation2], %s761_s9 }
  0x11   : > { %s197_s13 = sshll.u32 %s195_s12, 4  ;;  %s199_s15 = sshll.u32 %s191_s14, 4  ;;  %s198_s13 = int_to_ptr.hbm [resolvable:$true] %s197_s13  ;;  %s200_s15 = int_to_ptr.vmem [resolvable:$true] %s199_s15 }
  0x12   : > { %p1046_p13 = pnand %p807_p10, %p1020_p5  ;;  %p763_p0 = scmp.ge.s32.totalorder %s945_s21, 1 }
  0x13   : > { %p204_p1 = scmp.lt.s32.totalorder %s945_s21, 3  ;;  %s188_s17 = scalar_lea.sflag [#allocation3], %s187_s7 }
  0x14   : > { %s849_s23 = sshra.s32 %s198_s13, 4  ;;  %p853_p3 = pneg %p1046_p13  ;;  %s850_s23 = int_to_ptr.hbm [resolvable:$true] %s849_s23 }
  0x15   : > { %s851_s25 = scalar_lea.hbm %s850_s23, 4  ;;  %s856_s28 = scalar_lea.hbm %s1586_s4, 8 }
  0x16   : > { %p852_p2 = scmp.ne.s32.totalorder %s850_s23, %s851_s25  ;;  %p857_p5 = scmp.lt.s32.totalorder %s850_s23, %s1586_s4 }
  0x17   : > { %p858_p8 = scmp.lt.s32.totalorder %s856_s28, %s851_s25 }
  0x18   : > { %p854_p4 = pnand %p853_p3, %p852_p2 }
  0x19   : > { %p859_p10 = por %p858_p8, %p857_p5 }
  0x1a   : > { %p855_p7 = pneg %p854_p4 }
  0x1c   : > { %p860_p9 = pnand %p859_p10, %p855_p7 }
  0x1e   : > { %863 = shalt.err (!%p860_p9)
}
  0x1f   : > { %802 = dma.hbm_to_vmem [thread:$0]  (!%p1046_p13), %s198_s13, 64, %s200_s15, %s188_s17  }
  0x20   : > { %p205_p2 = pnand %p763_p0, %p204_p1 }
  0x21   : > { %s1067_s7 = sand.u32 (!%p205_p2), 1, %s937_s19  }
  0x22   : > { %208 = sbr.rel (%p205_p2) target bundleno = 429 (0x1ad), region = 40  ;;  %s764_s11 = sshll.u32 (!%p205_p2), %s1067_s7, 2 }
  0x23   : > { %s211_s12 = scalar_lea.sflag (!%p205_p2), [#allocation3], %s1067_s7  ;;  %s1071_s14 = scalar_lea.vmem (!%p205_p2), [#allocation2], %s764_s11 }
  0x27   : > { %924 = dma.done.wait (%p1024_p6), %s211_s12, 64  }
  0x28   : > { %926 = vsyncadd (%p1024_p6), %s211_s12, 4294967232  ;;  %s1077_s13 = scalar_lea.vmem [#allocation5], %s764_s11  ;;  %p766_p9 = scmp.ne.s32.totalorder %s1002_s22, 0 }
  0x2a   : > { %245 = sbr.rel (%p766_p9) target bundleno = 227 (0xe3), region = 48 }
  0x2f   : > { %v260_v0 = vld [vmem:[%s1582_s0 + $0x70] sm:$0xff]  ;;  %v261_v1 = vld [vmem:[%s1582_s0 + $0x78] sm:$0xff]  ;;  %vm368_vm0 = vcmask 1041408   ;;  %v258_v10 = vld [vmem:[%s1582_s0 + $0x60] sm:$0xff]  ;;  %v342_v39 = vlaneseq  ;;  %vm424_vm1 = vcmask 1043456   ;;  %vm430_vm5 = vcmask 945152  }
  0x30   : > { %v276_v2 = vld [vmem:[%s1582_s0 + $0xf0] sm:$0xff]  ;;  %v316_v3 = vpack.c.bf16 %v261_v1, %v260_v0  ;;  %v277_v4 = vld [vmem:[%s1582_s0 + $0xf8] sm:$0xff]  ;;  %v259_v11 = vld [vmem:[%s1582_s0 + $0x68] sm:$0xff]  ;;  %vm364_vm10 = vcmask 949248  }
  0x31   : > { %v292_v5 = vld [vmem:[%s1582_s0 + $0x170] sm:$0xff]  ;;  %v293_v6 = vld [vmem:[%s1582_s0 + $0x178] sm:$0xff]  ;;  %v324_v7 = vpack.c.bf16 %v277_v4, %v276_v2  ;;  %v315_v13 = vpack.c.bf16 %v259_v11, %v258_v10  ;;  %v274_v14 = vld [vmem:[%s1582_s0 + $0xe0] sm:$0xff]  ;;  %v343_v56 = vshrl.u32 %v342_v39, 7 }
  0x32   : > { %v332_v8 = vpack.c.bf16 %v293_v6, %v292_v5  ;;  %v308_v9 = vld [vmem:[%s1582_s0 + $0x1f0] sm:$0xf]  ;;  %372 = vmatpush.bf16.msra.mxu0 %v316_v3  ;;  %v275_v15 = vld [vmem:[%s1582_s0 + $0xe8] sm:$0xff]  ;;  %v290_v16 = vld [vmem:[%s1582_s0 + $0x160] sm:$0xff] }
  0x33   : > { %v340_v12 = vpack.c.bf16 %v308_v9, %v308_v9  ;;  %385 = vmatpush.bf16.msra.mxu1 %v324_v7  ;;  %v323_v17 = vpack.c.bf16 %v275_v15, %v274_v14  ;;  %v291_v18 = vld [vmem:[%s1582_s0 + $0x168] sm:$0xff]  ;;  %v306_v19 = vld [vmem:[%s1582_s0 + $0x1e0] sm:$0xff]  ;;  %v256_v23 = vld [vmem:[%s1582_s0 + $0x50] sm:$0xff]  ;;  %v947_v9 = vmov 0.0  }
  0x34   : > { %398 = vmatpush.bf16.msra.mxu2 %v332_v8  ;;  %v307_v20 = vld [vmem:[%s1582_s0 + $0x1e8] sm:$0xff]  ;;  %v331_v22 = vpack.c.bf16 %v291_v18, %v290_v16  ;;  %v257_v24 = vld [vmem:[%s1582_s0 + $0x58] sm:$0xff]  ;;  %v272_v25 = vld [vmem:[%s1582_s0 + $0xd0] sm:$0xff] }
  0x35   : > { %v370_v21 = vsel %vm368_vm0, %v340_v12, 0  ;;  %v339_v26 = vpack.c.bf16 %v307_v20, %v306_v19  ;;  %v273_v27 = vld [vmem:[%s1582_s0 + $0xd8] sm:$0xff]  ;;  %v288_v28 = vld [vmem:[%s1582_s0 + $0x150] sm:$0xff]  ;;  %v314_v30 = vpack.c.bf16 %v257_v24, %v256_v23  ;;  %v254_v33 = vld [vmem:[%s1582_s0 + $0x40] sm:$0xff]  ;;  %vm459_vm0 = vcmask 257024  }
  0x36   : > { %411 = vmatpush.bf16.msra.mxu3 %v370_v21  ;;  %v289_v29 = vld [vmem:[%s1582_s0 + $0x158] sm:$0xff]  ;;  %373 = vmatpush.bf16.msra.mxu0 %v315_v13  ;;  %v304_v31 = vld [vmem:[%s1582_s0 + $0x1d0] sm:$0xff]  ;;  %v322_v34 = vpack.c.bf16 %v273_v27, %v272_v25  ;;  %v255_v36 = vld [vmem:[%s1582_s0 + $0x48] sm:$0xff] }
  0x37   : > { %v305_v32 = vld [vmem:[%s1582_s0 + $0x1d8] sm:$0xff]  ;;  %386 = vmatpush.bf16.msra.mxu1 %v323_v17  ;;  %v330_v35 = vpack.c.bf16 %v289_v29, %v288_v28  ;;  %v270_v37 = vld [vmem:[%s1582_s0 + $0xc0] sm:$0xff]  ;;  %v271_v38 = vld [vmem:[%s1582_s0 + $0xc8] sm:$0xff]  ;;  %v313_v47 = vpack.c.bf16 %v255_v36, %v254_v33 }
  0x38   : > { %399 = vmatpush.bf16.msra.mxu2 %v331_v22  ;;  %v286_v40 = vld [vmem:[%s1582_s0 + $0x140] sm:$0xff]  ;;  %v287_v41 = vld [vmem:[%s1582_s0 + $0x148] sm:$0xff]  ;;  %v338_v43 = vpack.c.bf16 %v305_v32, %v304_v31  ;;  %v252_v45 = vld [vmem:[%s1582_s0 + $0x30] sm:$0xff]  ;;  %v321_v51 = vpack.c.bf16 %v271_v38, %v270_v37 }
  0x39   : > { %v302_v42 = vld [vmem:[%s1582_s0 + $0x1c0] sm:$0xff]  ;;  %v303_v44 = vld [vmem:[%s1582_s0 + $0x1c8] sm:$0xff]  ;;  %v253_v46 = vld [vmem:[%s1582_s0 + $0x38] sm:$0xff]  ;;  %v329_v52 = vpack.c.bf16 %v287_v41, %v286_v40 }
  0x3a   : > { %412 = vmatpush.bf16.msra.mxu3 %v339_v26  ;;  %374 = vmatpush.bf16.msra.mxu0 %v314_v30  ;;  %v268_v48 = vld [vmem:[%s1582_s0 + $0xb0] sm:$0xff]  ;;  %v269_v49 = vld [vmem:[%s1582_s0 + $0xb8] sm:$0xff]  ;;  %v337_v57 = vpack.c.bf16 %v303_v44, %v302_v42  ;;  %v341_v58 = vld [vmem:[%s1583_s1] sm:$0xf]  ;;  %v312_v63 = vpack.c.bf16 %v253_v46, %v252_v45 }
  0x3b   : > { %v284_v50 = vld [vmem:[%s1582_s0 + $0x130] sm:$0xff]  ;;  %387 = vmatpush.bf16.msra.mxu1 %v322_v34  ;;  %v285_v53 = vld [vmem:[%s1582_s0 + $0x138] sm:$0xff]  ;;  %v344_v59 = vperm.slane %v341_v58, 0  ;;  %v345_v60 = vperm.slane %v341_v58, 1  ;;  %v346_v61 = vperm.slane %v341_v58, 2  ;;  %v347_v62 = vperm.slane %v341_v58, 3 }
  0x3c   : > { %400 = vmatpush.bf16.msra.mxu2 %v330_v35  ;;  %v300_v54 = vld [vmem:[%s1582_s0 + $0x1b0] sm:$0xff]  ;;  %v301_v55 = vld [vmem:[%s1582_s0 + $0x1b8] sm:$0xff]  ;;  %v320_v0 = vpack.c.bf16 %v269_v49, %v268_v48  ;;  %v328_v1 = vpack.c.bf16 %v285_v53, %v284_v50  ;;  %v250_v6 = vld [vmem:[%s1582_s0 + $0x20] sm:$0xff] }
  0x3d   : > { %v336_v2 = vpack.c.bf16 %v301_v55, %v300_v54  ;;  %vm1200_vm2 = vcmp.eq.s32.totalorder %v344_v59, %v343_v56  ;;  %vm1204_vm3 = vcmp.eq.s32.totalorder %v345_v60, %v343_v56  ;;  %vm1208_vm4 = vcmp.eq.s32.totalorder %v346_v61, %v343_v56  ;;  %v251_v7 = vld [vmem:[%s1582_s0 + $0x28] sm:$0xff]  ;;  %v266_v8 = vld [vmem:[%s1582_s0 + $0xa0] sm:$0xff]  ;;  %v248_v27 = vld [vmem:[%s1582_s0 + $0x10] sm:$0xff] }
  0x3e   : > { %413 = vmatpush.bf16.msra.mxu3 %v338_v43  ;;  %375 = vmatpush.bf16.msra.mxu0 %v313_v47  ;;  %vm351_vm6 = vcmp.eq.s32.totalorder %v347_v62, %v343_v56  ;;  %v767_v10 = vsel %vm1200_vm2, 1.0, %v947_v9  ;;  %v768_v11 = vsel %vm1204_vm3, 1.0, %v947_v9  ;;  %v769_v12 = vsel %vm1208_vm4, 1.0, %v947_v9  ;;  %v267_v13 = vld [vmem:[%s1582_s0 + $0xa8] sm:$0xff]  ;;  %v282_v14 = vld [vmem:[%s1582_s0 + $0x120] sm:$0xff]  ;;  %v249_v28 = vld [vmem:[%s1582_s0 + $0x18] sm:$0xff] }
  0x3f   : > { %388 = vmatpush.bf16.msra.mxu1 %v321_v51  ;;  %v283_v15 = vld [vmem:[%s1582_s0 + $0x128] sm:$0xff]  ;;  %v1236_v16 = vsel %vm351_vm6, 1.0, %v947_v9  ;;  %v425_v17 = vsel %vm424_vm1, %v767_v10, 0.0  ;;  %v426_v18 = vsel %vm424_vm1, %v768_v11, 0.0  ;;  %v428_v19 = vsel %vm424_vm1, %v769_v12, 0.0  ;;  %v298_v22 = vld [vmem:[%s1582_s0 + $0x1a0] sm:$0xff]  ;;  %vm771_vm7 = vmpackc.low %vm1200_vm2, %vm1200_vm2 }
  0x40   : > { %401 = vmatpush.bf16.msra.mxu2 %v329_v52  ;;  %v427_v20 = vadd.f32 %v426_v18, %v425_v17  ;;  %v311_v21 = vpack.c.bf16 %v251_v7, %v250_v6  ;;  %v299_v23 = vld [vmem:[%s1582_s0 + $0x1a8] sm:$0xff]  ;;  %v431_v24 = vsel %vm430_vm5, %v1236_v16, 0.0  ;;  %v319_v25 = vpack.c.bf16 %v267_v13, %v266_v8  ;;  %v264_v29 = vld [vmem:[%s1582_s0 + $0x90] sm:$0xff]  ;;  %v265_v31 = vld [vmem:[%s1582_s0 + $0x98] sm:$0xff] }
  0x41   : > { %v327_v26 = vpack.c.bf16 %v283_v15, %v282_v14  ;;  %v280_v32 = vld [vmem:[%s1582_s0 + $0x110] sm:$0xff]  ;;  %v281_v33 = vld [vmem:[%s1582_s0 + $0x118] sm:$0xff]  ;;  %v335_v34 = vpack.c.bf16 %v299_v23, %v298_v22  ;;  %v310_v36 = vpack.c.bf16 %v249_v28, %v248_v27  ;;  %v318_v39 = vpack.c.bf16 %v265_v31, %v264_v29  ;;  %v246_v41 = vld [vmem:[%s1582_s0] sm:$0xff] }
  0x42   : > { %414 = vmatpush.bf16.msra.mxu3 %v337_v57  ;;  %376 = vmatpush.bf16.msra.mxu0 %v312_v63  ;;  %v429_v30 = vadd.f32 %v428_v19, %v427_v20  ;;  %v296_v37 = vld [vmem:[%s1582_s0 + $0x190] sm:$0xff]  ;;  %v297_v38 = vld [vmem:[%s1582_s0 + $0x198] sm:$0xff]  ;;  %v326_v40 = vpack.c.bf16 %v281_v33, %v280_v32  ;;  %v247_v42 = vld [vmem:[%s1582_s0 + $0x8] sm:$0xff]  ;;  %v363_v54 = vpack.c.bf16 %v1236_v16, %v1236_v16  ;;  %v948_v55 = vmov 1.0|1.0  }
  0x43   : > { %389 = vmatpush.bf16.msra.mxu1 %v320_v0  ;;  %v262_v43 = vld [vmem:[%s1582_s0 + $0x80] sm:$0xff]  ;;  %v263_v44 = vld [vmem:[%s1582_s0 + $0x88] sm:$0xff]  ;;  %v334_v47 = vpack.c.bf16 %v297_v38, %v296_v37  ;;  %v309_v48 = vpack.c.bf16 %v247_v42, %v246_v41  ;;  %vm773_vm8 = vmpackc.low %vm1204_vm3, %vm1204_vm3 }
  0x44   : > { %402 = vmatpush.bf16.msra.mxu2 %v328_v1  ;;  %v432_v35 = vadd.f32 %v431_v24, %v429_v30  ;;  %v278_v45 = vld [vmem:[%s1582_s0 + $0x100] sm:$0xff]  ;;  %v279_v46 = vld [vmem:[%s1582_s0 + $0x108] sm:$0xff]  ;;  %v317_v51 = vpack.c.bf16 %v263_v44, %v262_v43  ;;  %vm775_vm9 = vmpackc.low %vm1208_vm4, %vm1208_vm4 }
  0x45   : > { %v294_v49 = vld [vmem:[%s1582_s0 + $0x180] sm:$0xff]  ;;  %v295_v50 = vld [vmem:[%s1582_s0 + $0x188] sm:$0xff]  ;;  %v325_v52 = vpack.c.bf16 %v279_v46, %v278_v45 }
  0x46   : > { %415 = vmatpush.bf16.msra.mxu3 %v336_v2  ;;  %377 = vmatpush.bf16.msra.mxu0 %v311_v21  ;;  %v333_v53 = vpack.c.bf16 %v295_v50, %v294_v49  ;;  %v455_v12 = vld [vmem:[%s1071_s14] sm:$0xf] }
  0x47   : > { %390 = vmatpush.bf16.msra.mxu1 %v319_v25  ;;  %433 = vadd.xlane.f32.xlu0 %v432_v35  ;;  %v456_v15 = vmul.f32 0.9, %v455_v12 }
  0x48   : > { %403 = vmatpush.bf16.msra.mxu2 %v327_v26 }
  0x4a   : > { %416 = vmatpush.bf16.msra.mxu3 %v335_v34  ;;  %378 = vmatpush.bf16.msra.mxu0 %v310_v36 }
  0x4b   : > { %391 = vmatpush.bf16.msra.mxu1 %v318_v39 }
  0x4c   : > { %404 = vmatpush.bf16.msra.mxu2 %v326_v40 }
  0x4e   : > { %417 = vmatpush.bf16.msra.mxu3 %v334_v47  ;;  %379 = vmatpush.bf16.msra.mxu0 %v309_v48 }
  0x4f   : > { %392 = vmatpush.bf16.msra.mxu1 %v317_v51 }
  0x50   : > { %405 = vmatpush.bf16.msra.mxu2 %v325_v52 }
  0x51   : > { %772 = vmatmul.msk.bf16.vlgmr.msra.gmra.mxu0 %vm771_vm7, %v948_v55 }
  0x52   : > { %418 = vmatpush.bf16.msra.mxu3 %v333_v53  ;;  %774 = vmatmul.msk.bf16.vlgmr.msra.gmra.mxu1 %vm773_vm8, %v948_v55 }
  0x53   : > { %776 = vmatmul.msk.bf16.vlgmr.msra.gmra.mxu2 %vm775_vm9, %v948_v55 }
  0x55   : > { %777 = vmatmul.msk.bf16.vlgmr.msra.gmra.mxu3 %vm364_vm10, %v363_v54 }
  0xba   : > { %v434_v56 = vpop.xlane.xlu0 %433 }
  0xbb   : > { %v436_v57 = vmax.f32 %v434_v56, 1.0  ;;  %vm435_vm15 = vcmp.gt.f32.partialorder %v434_v56, 0.0 }
  0xbd   : > { %845 = vrcp.f32 %v436_v57  ;;  %vm442_vm11 = vweird.f32 %v436_v57  ;;  %v448_v0 = vand.u32 2147483648, %v436_v57  ;;  %v446_v3 = vand.u32 2147483647, %v436_v57 }
  0xbf   : > { %v449_v5 = vor.u32 1.1754944e-38, %v448_v0  ;;  %vm447_vm14 = vcmp.eq.f32.partialorder %v446_v3, 8.507059e+37 }
  0xc3   : > { %v846_v58 = vpop.eup %845 }
  0xc4   : > { %v438_v59 = vmul.f32 %v846_v58, %v436_v57  ;;  %vm443_vm12 = vweird.f32 %v846_v58 }
  0xc5   : > { %vm444_vm13 = vmor %vm442_vm11, %vm443_vm12 }
  0xc6   : > { %v439_v60 = vsub.f32 1.0, %v438_v59 }
  0xc8   : > { %v440_v62 = vmul.f32 %v846_v58, %v439_v60 }
  0xca   : > { %v441_v2 = vadd.f32 %v846_v58, %v440_v62 }
  0xcc   : > { %v445_v7 = vsel %vm444_vm13, %v846_v58, %v441_v2 }
  0xcd   : > { %v450_v13 = vsel %vm447_vm14, %v449_v5, %v445_v7 }
  0xce   : > { %v381_v61 = vpop.f32.mrf.mxu0 }
  0xcf   : > { %v394_v63 = vpop.f32.mrf.mxu1 }
  0xd0   : > { %v395_v1 = vadd.f32 %v394_v63, %v381_v61 }
  0xd6   : > { %v407_v4 = vpop.f32.mrf.mxu2  ;;  %v383_v8 = vpop.f32.mrf.mxu0 }
  0xd7   : > { %v408_v6 = vadd.f32 %v407_v4, %v395_v1  ;;  %v396_v10 = vpop.f32.mrf.mxu1 }
  0xd8   : > { %v420_v9 = vpop.f32.mrf.mxu3 }
  0xd9   : > { %v421_v11 = vadd.f32 %v420_v9, %v408_v6 }
  0xdb   : > { %v451_v14 = vmul.f32 %v450_v13, %v421_v11 }
  0xdd   : > { %v454_v16 = vsel %vm435_vm15, %v451_v14, 0.0 }
  0xde   : > { %v457_v17 = vmul.f32 0.1, %v454_v16  ;;  %v409_v18 = vpop.f32.mrf.mxu2 }
  0xe0   : > { %v458_v19 = vadd.f32 %v457_v17, %v456_v15  ;;  %v422_v20 = vpop.f32.mrf.mxu3 }
  0xe2   : > { %460 = vst.msk [vmem:[%s1077_s13] sm:$0xf] %vm459_vm0, %v458_v19 }
  0xe3 PF: > { %p778_p6 = scmp.ne.s32.totalorder %s1002_s22, 1 }
  0xe5   : > { %464 = sbr.rel (%p778_p6) target bundleno = 414 (0x19e), region = 52 }
  0xea   : > { %v479_v21 = vld [vmem:[%s1584_s2 + $0x70] sm:$0xff]  ;;  %v480_v22 = vld [vmem:[%s1584_s2 + $0x78] sm:$0xff]  ;;  %v477_v32 = vld [vmem:[%s1584_s2 + $0x60] sm:$0xff]  ;;  %v562_v59 = vlaneseq  ;;  %vm636_vm1 = vcmask 1043456   ;;  %vm670_vm15 = vcmask 257024  }
  0xeb   : > { %v495_v23 = vld [vmem:[%s1584_s2 + $0xf0] sm:$0xff]  ;;  %v536_v24 = vpack.c.bf16 %v480_v22, %v479_v21  ;;  %v496_v25 = vld [vmem:[%s1584_s2 + $0xf8] sm:$0xff]  ;;  %v478_v34 = vld [vmem:[%s1584_s2 + $0x68] sm:$0xff] }
  0xec   : > { %v511_v26 = vld [vmem:[%s1584_s2 + $0x170] sm:$0xff]  ;;  %v512_v27 = vld [vmem:[%s1584_s2 + $0x178] sm:$0xff]  ;;  %v544_v28 = vpack.c.bf16 %v496_v25, %v495_v23  ;;  %v493_v35 = vld [vmem:[%s1584_s2 + $0xe0] sm:$0xff]  ;;  %v535_v37 = vpack.c.bf16 %v478_v34, %v477_v32  ;;  %v563_v12 = vshrl.u32 %v562_v59, 7 }
  0xed   : > { %v552_v29 = vpack.c.bf16 %v512_v27, %v511_v26  ;;  %v527_v30 = vld [vmem:[%s1584_s2 + $0x1f0] sm:$0xff]  ;;  %v528_v31 = vld [vmem:[%s1584_s2 + $0x1f8] sm:$0xff]  ;;  %584 = vmatpush.bf16.msra.mxu0 %v536_v24  ;;  %v494_v36 = vld [vmem:[%s1584_s2 + $0xe8] sm:$0xff] }
  0xee   : > { %v560_v33 = vpack.c.bf16 %v528_v31, %v527_v30  ;;  %597 = vmatpush.bf16.msra.mxu1 %v544_v28  ;;  %v543_v38 = vpack.c.bf16 %v494_v36, %v493_v35  ;;  %v509_v39 = vld [vmem:[%s1584_s2 + $0x160] sm:$0xff]  ;;  %v510_v40 = vld [vmem:[%s1584_s2 + $0x168] sm:$0xff]  ;;  %v475_v44 = vld [vmem:[%s1584_s2 + $0x50] sm:$0xff]  ;;  %v949_v31 = vmov 0.0  }
  0xef   : > { %610 = vmatpush.bf16.msra.mxu2 %v552_v29  ;;  %v525_v41 = vld [vmem:[%s1584_s2 + $0x1e0] sm:$0xff]  ;;  %v551_v42 = vpack.c.bf16 %v510_v40, %v509_v39  ;;  %v526_v43 = vld [vmem:[%s1584_s2 + $0x1e8] sm:$0xff]  ;;  %v476_v45 = vld [vmem:[%s1584_s2 + $0x58] sm:$0xff] }
  0xf0   : > { %623 = vmatpush.bf16.msra.mxu3 %v560_v33  ;;  %v559_v46 = vpack.c.bf16 %v526_v43, %v525_v41  ;;  %v491_v47 = vld [vmem:[%s1584_s2 + $0xd0] sm:$0xff]  ;;  %v492_v48 = vld [vmem:[%s1584_s2 + $0xd8] sm:$0xff]  ;;  %v534_v50 = vpack.c.bf16 %v476_v45, %v475_v44  ;;  %v473_v56 = vld [vmem:[%s1584_s2 + $0x40] sm:$0xff] }
  0xf1   : > { %v507_v49 = vld [vmem:[%s1584_s2 + $0x150] sm:$0xff]  ;;  %585 = vmatpush.bf16.msra.mxu0 %v535_v37  ;;  %v508_v51 = vld [vmem:[%s1584_s2 + $0x158] sm:$0xff]  ;;  %v542_v54 = vpack.c.bf16 %v492_v48, %v491_v47  ;;  %v474_v57 = vld [vmem:[%s1584_s2 + $0x48] sm:$0xff] }
  0xf2   : > { %v523_v52 = vld [vmem:[%s1584_s2 + $0x1d0] sm:$0xff]  ;;  %v524_v53 = vld [vmem:[%s1584_s2 + $0x1d8] sm:$0xff]  ;;  %598 = vmatpush.bf16.msra.mxu1 %v543_v38  ;;  %v550_v55 = vpack.c.bf16 %v508_v51, %v507_v49  ;;  %v489_v58 = vld [vmem:[%s1584_s2 + $0xc0] sm:$0xff]  ;;  %v533_v3 = vpack.c.bf16 %v474_v57, %v473_v56 }
  0xf3   : > { %611 = vmatpush.bf16.msra.mxu2 %v551_v42  ;;  %v558_v60 = vpack.c.bf16 %v524_v53, %v523_v52  ;;  %v490_v61 = vld [vmem:[%s1584_s2 + $0xc8] sm:$0xff]  ;;  %v505_v62 = vld [vmem:[%s1584_s2 + $0x140] sm:$0xff]  ;;  %v471_v2 = vld [vmem:[%s1584_s2 + $0x30] sm:$0xff] }
  0xf4   : > { %624 = vmatpush.bf16.msra.mxu3 %v559_v46  ;;  %v506_v63 = vld [vmem:[%s1584_s2 + $0x148] sm:$0xff]  ;;  %v521_v0 = vld [vmem:[%s1584_s2 + $0x1c0] sm:$0xff]  ;;  %v472_v4 = vld [vmem:[%s1584_s2 + $0x38] sm:$0xff]  ;;  %v541_v7 = vpack.c.bf16 %v490_v61, %v489_v58 }
  0xf5   : > { %v522_v1 = vld [vmem:[%s1584_s2 + $0x1c8] sm:$0xff]  ;;  %586 = vmatpush.bf16.msra.mxu0 %v534_v50  ;;  %v487_v5 = vld [vmem:[%s1584_s2 + $0xb0] sm:$0xff]  ;;  %v488_v6 = vld [vmem:[%s1584_s2 + $0xb8] sm:$0xff]  ;;  %v549_v8 = vpack.c.bf16 %v506_v63, %v505_v62  ;;  %v532_v16 = vpack.c.bf16 %v472_v4, %v471_v2 }
  0xf6   : > { %599 = vmatpush.bf16.msra.mxu1 %v542_v54  ;;  %v503_v9 = vld [vmem:[%s1584_s2 + $0x130] sm:$0xff]  ;;  %v504_v10 = vld [vmem:[%s1584_s2 + $0x138] sm:$0xff]  ;;  %v557_v13 = vpack.c.bf16 %v522_v1, %v521_v0  ;;  %v561_v15 = vld [vmem:[%s1585_s3] sm:$0xf]  ;;  %v540_v20 = vpack.c.bf16 %v488_v6, %v487_v5 }
  0xf7   : > { %612 = vmatpush.bf16.msra.mxu2 %v550_v55  ;;  %v519_v11 = vld [vmem:[%s1584_s2 + $0x1b0] sm:$0xff]  ;;  %v520_v14 = vld [vmem:[%s1584_s2 + $0x1b8] sm:$0xff]  ;;  %v564_v17 = vperm.slane %v561_v15, 0  ;;  %v565_v18 = vperm.slane %v561_v15, 1  ;;  %v566_v19 = vperm.slane %v561_v15, 2  ;;  %v548_v21 = vpack.c.bf16 %v504_v10, %v503_v9  ;;  %v469_v27 = vld [vmem:[%s1584_s2 + $0x20] sm:$0xff] }
  0xf8   : > { %625 = vmatpush.bf16.msra.mxu3 %v558_v60  ;;  %v556_v22 = vpack.c.bf16 %v520_v14, %v519_v11  ;;  %v567_v23 = vperm.slane %v561_v15, 3  ;;  %v470_v28 = vld [vmem:[%s1584_s2 + $0x28] sm:$0xff]  ;;  %v485_v29 = vld [vmem:[%s1584_s2 + $0xa0] sm:$0xff]  ;;  %v467_v49 = vld [vmem:[%s1584_s2 + $0x10] sm:$0xff] }
  0xf9   : > { %587 = vmatpush.bf16.msra.mxu0 %v533_v3  ;;  %vm1434_vm2 = vcmp.eq.s32.totalorder %v564_v17, %v563_v12  ;;  %vm1438_vm3 = vcmp.eq.s32.totalorder %v565_v18, %v563_v12  ;;  %vm1442_vm4 = vcmp.eq.s32.totalorder %v566_v19, %v563_v12  ;;  %v486_v35 = vld [vmem:[%s1584_s2 + $0xa8] sm:$0xff]  ;;  %v501_v36 = vld [vmem:[%s1584_s2 + $0x120] sm:$0xff]  ;;  %v531_v45 = vpack.c.bf16 %v470_v28, %v469_v27  ;;  %v468_v50 = vld [vmem:[%s1584_s2 + $0x18] sm:$0xff] }
  0xfa   : > { %600 = vmatpush.bf16.msra.mxu1 %v541_v7  ;;  %vm1455_vm5 = vcmp.eq.s32.totalorder %v567_v23, %v563_v12  ;;  %v779_v32 = vsel %vm1434_vm2, 1.0, %v949_v31  ;;  %v780_v33 = vsel %vm1438_vm3, 1.0, %v949_v31  ;;  %v781_v34 = vsel %vm1442_vm4, 1.0, %v949_v31  ;;  %v502_v37 = vld [vmem:[%s1584_s2 + $0x128] sm:$0xff]  ;;  %v517_v42 = vld [vmem:[%s1584_s2 + $0x1a0] sm:$0xff]  ;;  %v483_v51 = vld [vmem:[%s1584_s2 + $0x90] sm:$0xff] }
  0xfb   : > { %613 = vmatpush.bf16.msra.mxu2 %v549_v8  ;;  %v782_v38 = vsel %vm1455_vm5, 1.0, %v949_v31  ;;  %v637_v39 = vsel %vm636_vm1, %v779_v32, 0.0  ;;  %v638_v40 = vsel %vm636_vm1, %v780_v33, 0.0  ;;  %v640_v41 = vsel %vm636_vm1, %v781_v34, 0.0  ;;  %v518_v43 = vld [vmem:[%s1584_s2 + $0x1a8] sm:$0xff]  ;;  %v484_v54 = vld [vmem:[%s1584_s2 + $0x98] sm:$0xff]  ;;  %vm783_vm6 = vmpackc.low %vm1434_vm2, %vm1434_vm2 }
  0xfc   : > { %626 = vmatpush.bf16.msra.mxu3 %v557_v13  ;;  %v639_v44 = vadd.f32 %v638_v40, %v637_v39  ;;  %v642_v46 = vsel %vm636_vm1, %v782_v38, 0.0  ;;  %v539_v47 = vpack.c.bf16 %v486_v35, %v485_v29  ;;  %v547_v48 = vpack.c.bf16 %v502_v37, %v501_v36  ;;  %v499_v55 = vld [vmem:[%s1584_s2 + $0x110] sm:$0xff]  ;;  %v500_v56 = vld [vmem:[%s1584_s2 + $0x118] sm:$0xff]  ;;  %v465_v63 = vld [vmem:[%s1584_s2] sm:$0xff] }
  0xfd   : > { %588 = vmatpush.bf16.msra.mxu0 %v532_v16  ;;  %v555_v53 = vpack.c.bf16 %v518_v43, %v517_v42  ;;  %v515_v57 = vld [vmem:[%s1584_s2 + $0x190] sm:$0xff]  ;;  %v516_v58 = vld [vmem:[%s1584_s2 + $0x198] sm:$0xff]  ;;  %v530_v60 = vpack.c.bf16 %v468_v50, %v467_v49  ;;  %v538_v61 = vpack.c.bf16 %v484_v54, %v483_v51  ;;  %v546_v62 = vpack.c.bf16 %v500_v56, %v499_v55  ;;  %v466_v0 = vld [vmem:[%s1584_s2 + $0x8] sm:$0xff] }
  0xfe   : > { %601 = vmatpush.bf16.msra.mxu1 %v540_v20  ;;  %v641_v52 = vadd.f32 %v640_v41, %v639_v44  ;;  %v481_v1 = vld [vmem:[%s1584_s2 + $0x80] sm:$0xff]  ;;  %v554_v2 = vpack.c.bf16 %v516_v58, %v515_v57  ;;  %v482_v3 = vld [vmem:[%s1584_s2 + $0x88] sm:$0xff]  ;;  %v529_v8 = vpack.c.bf16 %v466_v0, %v465_v63  ;;  %vm785_vm7 = vmpackc.low %vm1438_vm3, %vm1438_vm3  ;;  %v950_v12 = vmov 1.0|1.0  }
  0xff   : > { %614 = vmatpush.bf16.msra.mxu2 %v548_v21  ;;  %v497_v4 = vld [vmem:[%s1584_s2 + $0x100] sm:$0xff]  ;;  %v498_v5 = vld [vmem:[%s1584_s2 + $0x108] sm:$0xff]  ;;  %v537_v9 = vpack.c.bf16 %v482_v3, %v481_v1  ;;  %vm787_vm8 = vmpackc.low %vm1442_vm4, %vm1442_vm4 }
 0x100   : > { %627 = vmatpush.bf16.msra.mxu3 %v556_v22  ;;  %v643_v59 = vadd.f32 %v642_v46, %v641_v52  ;;  %v513_v6 = vld [vmem:[%s1584_s2 + $0x180] sm:$0xff]  ;;  %v514_v7 = vld [vmem:[%s1584_s2 + $0x188] sm:$0xff]  ;;  %v545_v10 = vpack.c.bf16 %v498_v5, %v497_v4  ;;  %vm789_vm9 = vmpackc.low %vm1455_vm5, %vm1455_vm5 }
 0x101   : > { %589 = vmatpush.bf16.msra.mxu0 %v531_v45  ;;  %v553_v11 = vpack.c.bf16 %v514_v7, %v513_v6  ;;  %v666_v33 = vld [vmem:[%s1071_s14] sm:$0xf] }
 0x102   : > { %602 = vmatpush.bf16.msra.mxu1 %v539_v47  ;;  %644 = vadd.xlane.f32.xlu0 %v643_v59  ;;  %v667_v36 = vmul.f32 0.9, %v666_v33 }
 0x103   : > { %615 = vmatpush.bf16.msra.mxu2 %v547_v48 }
 0x104   : > { %628 = vmatpush.bf16.msra.mxu3 %v555_v53 }
 0x105   : > { %590 = vmatpush.bf16.msra.mxu0 %v530_v60 }
 0x106   : > { %603 = vmatpush.bf16.msra.mxu1 %v538_v61 }
 0x107   : > { %616 = vmatpush.bf16.msra.mxu2 %v546_v62 }
 0x108   : > { %629 = vmatpush.bf16.msra.mxu3 %v554_v2 }
 0x109   : > { %591 = vmatpush.bf16.msra.mxu0 %v529_v8 }
 0x10a   : > { %604 = vmatpush.bf16.msra.mxu1 %v537_v9 }
 0x10b   : > { %617 = vmatpush.bf16.msra.mxu2 %v545_v10 }
 0x10c   : > { %630 = vmatpush.bf16.msra.mxu3 %v553_v11  ;;  %784 = vmatmul.msk.bf16.vlgmr.msra.gmra.mxu0 %vm783_vm6, %v950_v12 }
 0x10d   : > { %786 = vmatmul.msk.bf16.vlgmr.msra.gmra.mxu1 %vm785_vm7, %v950_v12 }
 0x10e   : > { %788 = vmatmul.msk.bf16.vlgmr.msra.gmra.mxu2 %vm787_vm8, %v950_v12 }
 0x10f   : > { %790 = vmatmul.msk.bf16.vlgmr.msra.gmra.mxu3 %vm789_vm9, %v950_v12 }
 0x175   : > { %v645_v13 = vpop.xlane.xlu0 %644 }
 0x176   : > { %v647_v14 = vmax.f32 %v645_v13, 1.0  ;;  %vm646_vm14 = vcmp.gt.f32.partialorder %v645_v13, 0.0 }
 0x178   : > { %847 = vrcp.f32 %v647_v14  ;;  %vm653_vm10 = vweird.f32 %v647_v14  ;;  %v659_v21 = vand.u32 2147483648, %v647_v14  ;;  %v657_v24 = vand.u32 2147483647, %v647_v14 }
 0x17a   : > { %v660_v26 = vor.u32 1.1754944e-38, %v659_v21  ;;  %vm658_vm13 = vcmp.eq.f32.partialorder %v657_v24, 8.507059e+37 }
 0x17e   : > { %v848_v15 = vpop.eup %847 }
 0x17f   : > { %v649_v16 = vmul.f32 %v848_v15, %v647_v14  ;;  %vm654_vm11 = vweird.f32 %v848_v15 }
 0x180   : > { %vm655_vm12 = vmor %vm653_vm10, %vm654_vm11 }
 0x181   : > { %v650_v17 = vsub.f32 1.0, %v649_v16 }
 0x183   : > { %v651_v19 = vmul.f32 %v848_v15, %v650_v17 }
 0x185   : > { %v652_v23 = vadd.f32 %v848_v15, %v651_v19 }
 0x187   : > { %v656_v29 = vsel %vm655_vm12, %v848_v15, %v652_v23 }
 0x188   : > { %v661_v34 = vsel %vm658_vm13, %v660_v26, %v656_v29 }
 0x189   : > { %v593_v18 = vpop.f32.mrf.mxu0 }
 0x18a   : > { %v606_v20 = vpop.f32.mrf.mxu1 }
 0x18b   : > { %v607_v22 = vadd.f32 %v606_v20, %v593_v18 }
 0x191   : > { %v619_v25 = vpop.f32.mrf.mxu2  ;;  %v595_v30 = vpop.f32.mrf.mxu0 }
 0x192   : > { %v620_v27 = vadd.f32 %v619_v25, %v607_v22  ;;  %v632_v28 = vpop.f32.mrf.mxu3  ;;  %v608_v31 = vpop.f32.mrf.mxu1 }
 0x194   : > { %v633_v32 = vadd.f32 %v632_v28, %v620_v27 }
 0x196   : > { %v662_v35 = vmul.f32 %v661_v34, %v633_v32 }
 0x198   : > { %v665_v37 = vsel %vm646_vm14, %v662_v35, 0.0 }
 0x199   : > { %v668_v38 = vmul.f32 0.1, %v665_v37  ;;  %v621_v39 = vpop.f32.mrf.mxu2 }
 0x19a   : > { %v634_v40 = vpop.f32.mrf.mxu3 }
 0x19b   : > { %v669_v41 = vadd.f32 %v668_v38, %v667_v36 }
 0x19d   : > { %671 = vst.msk [vmem:[%s1077_s13] sm:$0xf] %vm670_vm15, %v669_v41 }
 0x19e PF: > { %s792_s11 = sshll.u32 %s1002_s22, 2  ;;  %s685_s16 = sshll.u32 %s1077_s13, 4  ;;  %s686_s16 = int_to_ptr.vmem [resolvable:$true] %s685_s16 }
 0x19f   : > { %s683_s14 = scalar_lea.hbm %s1587_s5, %s792_s11  ;;  %s673_s23 = scalar_lea.sflag [#allocation4], %s1067_s7 }
 0x1a0   : > { %s687_s17 = sshll.u32 %s683_s14, 4  ;;  %s899_s22 = scalar_lea.hbm %s1587_s5, 8  ;;  %s688_s17 = int_to_ptr.hbm [resolvable:$true] %s687_s17 }
 0x1a1   : > { %s893_s25 = sshra.s32 %s688_s17, 4  ;;  %s894_s25 = int_to_ptr.hbm [resolvable:$true] %s893_s25 }
 0x1a2   : > { %s895_s26 = scalar_lea.hbm %s894_s25, 4  ;;  %p900_p3 = scmp.lt.s32.totalorder %s894_s25, %s1587_s5 }
 0x1a3   : > { %p896_p13 = scmp.ne.s32.totalorder %s894_s25, %s895_s26  ;;  %p901_p4 = scmp.lt.s32.totalorder %s899_s22, %s895_s26 }
 0x1a5   : > { %p897_p0 = pnand %p896_p13, %p1031_p11  ;;  %p902_p7 = por %p901_p4, %p900_p3 }
 0x1a7   : > { %p898_p1 = pneg %p897_p0 }
 0x1a9   : > { %p903_p5 = pnand %p902_p7, %p898_p1 }
 0x1ab   : > { %906 = shalt.err (!%p903_p5)
}
 0x1ac   : > { %797 = dma.vmem_to_hbm [thread:$0]  (%p1031_p11), %s686_s16, 64, %s688_s17, %s673_s23  }
 0x1ad PF: > { %s699_s7 = sand.u32 1, %s933_s18   ;;  %p1607_p8 = scmp.ge.s32.totalorder %s945_s21, 2 }
 0x1ae   : > { %s700_s13 = scalar_lea.sflag [#allocation4], %s699_s7 }
 0x1af   : > { %p804_p10 = pnand %p1607_p8, %p1035_p12 }
 0x1b1   : > { %p805_p2 = pneg %p804_p10 }
 0x1b3   : > { %928 = dma.done.wait (%p805_p2), %s700_s13, 64  }
 0x1b4   : > { %930 = vsyncadd (%p805_p2), %s700_s13, 4294967232  ;;  %p18_p9 = scmp.ge.s32.totalorder %s1006_s24, 4   ;;  %s1608_s18 = smov %s937_s19 }
 0x1b5   : > { %s1609_s19 = smov %s941_s20  ;;  %s1610_s20 = smov %s1018_s27 }
 0x1b6   : > { %s1611_s21 = smov %s1006_s24  ;;  %20 = sbr.rel (!%p18_p9) target bundleno = 5 (0x5), region = 93 }
 0x1bb   :  { %706 = vsyncpa [#allocation3], 1 }
 0x1bc   :  { %708 = vsyncpa [#allocation3 + $0x1], 1 }
 0x1bd   :  { %709 = vsyncpa [#allocation4], 1 }
 0x1be   :  { %711 = vsyncpa [#allocation4 + $0x1], 1 }

</bundles_post_ra>
